<compile_context>
chip_gen: v7x
topology: tpu7x:2x2x1
jax: 0.10.0
libtpu: 0.0.40
codegen_flags: <defaults>
</compile_context>

<pallas_src>
import math
import functools

import jax
import jax.numpy as jnp
from jax.experimental import pallas as pl
from jax.experimental.pallas import tpu as pltpu

# --- small synthetic configuration (consistent with the module's __init__) ---
B = 2            # batch
N = 8            # sequence length
H = 2            # num_heads
D = 16           # h_dim (dim per head)
M = 16           # nb_features        (outer performer features)
F_IN = 8         # nb_features_inner  (RFF features, half cos / half sin)
COORDS_DIM = 2   # coords carry COORDS_DIM + 1 = 3 components (x, y, angle)
R = COORDS_DIM   # number of rpe "distances" (1 dR row + R-1 dAngle rows)
NUM_W_PER_DIST = 4
K = NUM_W_PER_DIST // 2
RF = COORDS_DIM * F_IN          # per-head phi feature width = 16
NCOLS = D + RF                  # augmented feature dim = 32
SOFTMAX_EPS = 1e-6
NORM_EPS = 1e-6

_SCALE = math.sqrt(1.0 / math.sqrt(D))   # sqrt(softmax_temp), softmax_temp=1/sqrt(D)
_RATIO = 1.0 / math.sqrt(M)


# ------------------------------ Pallas kernel --------------------------------
def _flt_fused_kernel(q_ref, k_ref, v_ref, phi_ref, mask_ref,
                      projd_ref, projphi_ref, outw_ref, outb_ref, o_ref):
    """Fused FLT attention forward.

    q_ref/k_ref/v_ref: (B*N, H*D)   rows ordered (b, n), heads in lanes
    phi_ref:           (B*N, H*RF)  shared rel-pos features (per head in lanes)
    mask_ref:          (B*N, 1)     key padding mask (1.0 keep, 0.0 pad)
    projd_ref:         (H*D, H*M)   block-diag of projection[:, :D].T per head
    projphi_ref:       (H*RF, H*M)  block-diag of projection[:, D:].T per head
    outw_ref:          (D, H*D)     out_linear weight
    outb_ref:          (1, D)       out_linear bias
    o_ref:             (B, N, D)
    """
    q2 = q_ref[...] * _SCALE        # (B*N, H*D), scaled by sqrt(softmax_temp)
    k2 = k_ref[...] * _SCALE
    v2 = v_ref[...]
    phi2 = phi_ref[...]             # (B*N, H*RF)
    mask = mask_ref[...]            # (B*N, 1)
    proj_d = projd_ref[...]
    proj_phi = projphi_ref[...]
    w_out = outw_ref[...]           # (D, H*D)
    bias = outb_ref[...]            # (1, D)

    # --- performer feature map: one lane-dense MXU contraction per tensor,
    #     batched over all B*N rows and both heads (block-diag projections).
    #     phi projection computed once and shared between q and k.
    phi_dash = jnp.dot(phi2, proj_phi, preferred_element_type=jnp.float32)
    q_dash = jnp.dot(q2, proj_d, preferred_element_type=jnp.float32) + phi_dash
    k_dash = jnp.dot(k2, proj_d, preferred_element_type=jnp.float32) + phi_dash

    # Global stabilization max for the key path — matches the PyTorch
    # softmax_kernel which takes max over the whole (B,H,N,M) tensor,
    # computed before the key-padding mask is applied (as in the reference).
    k_max = jnp.max(k_dash)

    q_primes, k_primes = [], []
    for h in range(H):
        qh = q2[:, h * D:(h + 1) * D]                 # (B*N, D), already scaled
        kh = k2[:, h * D:(h + 1) * D]
        ph = phi2[:, h * RF:(h + 1) * RF]             # (B*N, RF)

        phi_sq = jnp.sum(ph * ph, axis=-1, keepdims=True)          # shared q/k
        q_diag = 0.5 * (jnp.sum(qh * qh, axis=-1, keepdims=True) + phi_sq)
        k_diag = 0.5 * (jnp.sum(kh * kh, axis=-1, keepdims=True) + phi_sq)

        qd = q_dash[:, h * M:(h + 1) * M]                           # (B*N, M)
        kd = k_dash[:, h * M:(h + 1) * M]

        q_prime = _RATIO * (jnp.exp(qd - q_diag
                                    - jnp.max(qd, axis=-1, keepdims=True))
                            + SOFTMAX_EPS)
        k_prime = _RATIO * (jnp.exp(kd - k_diag - k_max) + SOFTMAX_EPS)
        q_primes.append(q_prime)
        k_primes.append(k_prime * mask)                             # key padding

    # --- linear attention + fused out_linear (accumulate over heads) ---
    for b in range(B):
        r0, r1 = b * N, (b + 1) * N
        acc = jnp.zeros((N, D), jnp.float32)
        for h in range(H):
            qp = q_primes[h][r0:r1, :]                              # (N, M)
            kp = k_primes[h][r0:r1, :]                              # (N, M)
            vb = v2[r0:r1, h * D:(h + 1) * D]                       # (N, D)

            k_sum = jnp.sum(kp, axis=0, keepdims=True)              # (1, M)
            denom = jnp.sum(qp * k_sum, axis=-1, keepdims=True)     # (N, 1)
            ctx = jnp.einsum("nm,nd->md", kp, vb,
                             preferred_element_type=jnp.float32)    # (M, D)
            o_bh = jnp.einsum("nm,md->nd", qp, ctx,
                              preferred_element_type=jnp.float32)   # (N, D)
            o_bh = o_bh * pl.reciprocal(denom + NORM_EPS, approx=True)

            # fused out_linear: accumulate this head's slice of the weight.
            acc = acc + jnp.einsum("nd,od->no", o_bh,
                                   w_out[:, h * D:(h + 1) * D],
                                   preferred_element_type=jnp.float32)
        o_ref[b] = (acc + bias).astype(o_ref.dtype)


def flt_fused(q2, k2, v2, phi2, mask2, proj_d_bd, proj_phi_bd, out_w, out_b):
    """Single fused pallas_call (everything fits comfortably in VMEM)."""
    return pl.pallas_call(
        _flt_fused_kernel,
        out_shape=jax.ShapeDtypeStruct((B, N, D), jnp.float32),
        grid_spec=pltpu.PrefetchScalarGridSpec(
            num_scalar_prefetch=0,
            grid=(1,),
            in_specs=[
                pl.BlockSpec((B * N, H * D), lambda i: (0, 0)),
                pl.BlockSpec((B * N, H * D), lambda i: (0, 0)),
                pl.BlockSpec((B * N, H * D), lambda i: (0, 0)),
                pl.BlockSpec((B * N, H * RF), lambda i: (0, 0)),
                pl.BlockSpec((B * N, 1), lambda i: (0, 0)),
                pl.BlockSpec((H * D, H * M), lambda i: (0, 0)),
                pl.BlockSpec((H * RF, H * M), lambda i: (0, 0)),
                pl.BlockSpec((D, H * D), lambda i: (0, 0)),
                pl.BlockSpec((1, D), lambda i: (0, 0)),
            ],
            out_specs=pl.BlockSpec((B, N, D), lambda i: (0, 0, 0)),
        ),
        compiler_params=pltpu.CompilerParams(
            dimension_semantics=("arbitrary",)),
    )(q2, k2, v2, phi2, mask2, proj_d_bd, proj_phi_bd, out_w, out_b)


# ------------------------------- glue / wrapper ------------------------------
def init_params(key):
    # TODO(synk): gaussian_orthogonal_random_matrix / orthogonal RFF omegas are
    # buffer initializers (not forward compute); plain Gaussian draws are used.
    ks = jax.random.split(key, 5)
    return {
        "omega_dR": jax.random.normal(ks[0], (2, F_IN // 2), jnp.float32),
        "omega_dAngle": jax.random.normal(ks[1], (1, F_IN // 2), jnp.float32),
        "projection_matrix": jax.random.normal(ks[2], (M, NCOLS), jnp.float32),
        "w_rpe_weight": 0.1 * jax.random.normal(ks[3], (H * D, R * 2 * K),
                                                jnp.float32),
        "out_w": jax.random.normal(ks[4], (D, H * D),
                                   jnp.float32) / math.sqrt(H * D),
        "out_b": jnp.zeros((1, D), jnp.float32),
    }


def flt_attention_forward(params, query, key_in, value, coords,
                          key_padding_mask):
    # rpe-weight processing: '(h d) (r c k) -> c h d r k', sum/clamp/exp/sum
    w = params["w_rpe_weight"].reshape(H, D, R, 2, K).transpose(3, 0, 1, 2, 4)
    s = jnp.exp(jnp.minimum(jnp.sum(w, axis=2), 50.0)).sum(axis=-1)  # (2,h,r)
    alpha, qw = s[0], s[1]                                           # (h,r) each
    new_qw = jnp.concatenate([qw[:, :1], qw], axis=-1)               # (h, r+1)

    # RFF relative-position features, built directly in (b, n, h, ...) order so
    # the flatten below matches the memory order of the (B, N, H*D) q/k/v
    # tensors — no XLA transposes anywhere in this wrapper.
    sqrt_w_r = jnp.sqrt(new_qw)[None, None] * coords[:, :, None, :]  # (b,n,h,r+1)
    dR = sqrt_w_r[..., :2]                                           # (b,n,h,2)
    dAngle = sqrt_w_r[..., 2:]                                       # (b,n,h,r-1)

    u_dR = jnp.einsum("bnhc,cf->bnhf", dR, params["omega_dR"])
    phi_dR = jnp.concatenate([jnp.cos(u_dR), jnp.sin(u_dR)],
                             axis=-1) * math.sqrt(2.0 / F_IN)
    phi_dR = phi_dR[..., None, :]                                    # (b,n,h,1,F)

    u_dA = dAngle[..., None] * params["omega_dAngle"][0]             # (b,n,h,r-1,F/2)
    phi_dA = jnp.concatenate([jnp.cos(u_dA), jnp.sin(u_dA)],
                             axis=-1) * math.sqrt(2.0 / F_IN)

    phi = jnp.concatenate([phi_dR, phi_dA], axis=-2)                 # (b,n,h,r,F)
    phi = phi * jnp.sqrt(alpha)[None, None, :, :, None]
    phi2 = phi.reshape(B * N, H * RF)                                # free reshape

    # memory-order-preserving reshapes of the big tensors (no transpose).
    q2 = query.reshape(B * N, H * D)
    k2 = key_in.reshape(B * N, H * D)
    v2 = value.reshape(B * N, H * D)
    mask2 = key_padding_mask.astype(jnp.float32).reshape(B * N, 1)

    # Per-head D->M and RF->M projections batched into single lane-dense
    # contractions via block-diagonal matrices (tiny; constant-folded by XLA).
    proj = params["projection_matrix"]                               # (M, NCOLS)
    eye_h = jnp.eye(H, dtype=jnp.float32)
    proj_d_bd = jnp.kron(eye_h, proj[:, :D].T)                       # (H*D, H*M)
    proj_phi_bd = jnp.kron(eye_h, proj[:, D:].T)                     # (H*RF, H*M)

    return flt_fused(q2, k2, v2, phi2, mask2, proj_d_bd, proj_phi_bd,
                     params["out_w"], params["out_b"])               # (B, N, D)


if __name__ == "__main__":
    root = jax.random.PRNGKey(0)
    k1, k2, k3, k4, kp = jax.random.split(root, 5)
    query = jax.random.normal(k1, (B, N, H * D), jnp.float32)
    key_in = jax.random.normal(k2, (B, N, H * D), jnp.float32)
    value = jax.random.normal(k3, (B, N, H * D), jnp.float32)
    coords = jax.random.normal(k4, (B, N, COORDS_DIM + 1), jnp.float32)
    key_padding_mask = jnp.ones((B, N), jnp.bool_).at[:, -1].set(False)

    params = init_params(kp)
    fwd = jax.jit(functools.partial(flt_attention_forward, params))
    out = fwd(query, key_in, value, coords, key_padding_mask)
    jax.block_until_ready(out)

    assert out.shape == (B, N, D), out.shape
    assert bool(jnp.all(jnp.isfinite(out)))
    print("KERNEL_OK")
</pallas_src>

<mosaic_0001>
module attributes {stable_mosaic.version = 11 : i64} {
  func.func @_flt_fused_kernel(%arg0: i32, %arg1: memref<16x32xf32, #tpu.memory_space<vmem>>, %arg2: memref<16x32xf32, #tpu.memory_space<vmem>>, %arg3: memref<16x32xf32, #tpu.memory_space<vmem>>, %arg4: memref<16x32xf32, #tpu.memory_space<vmem>>, %arg5: memref<16x1xf32, #tpu.memory_space<vmem>>, %arg6: memref<32x32xf32, #tpu.memory_space<vmem>>, %arg7: memref<32x32xf32, #tpu.memory_space<vmem>>, %arg8: memref<16x32xf32, #tpu.memory_space<vmem>>, %arg9: memref<1x16xf32, #tpu.memory_space<vmem>>, %arg10: memref<2x8x16xf32, #tpu.memory_space<vmem>>) attributes {dimension_semantics = [#tpu.dimension_semantics<arbitrary>], iteration_bounds = array<i64: 1>, scalar_prefetch = 0 : i64, scratch_operands = 0 : i64, tpu.core_type = #tpu.core_type<tc>, window_params = [{pipeline_mode = #tpu.pipeline_mode<synchronous>, transform_indices = @transform_0, window_bounds = array<i64: 16, 32>}, {pipeline_mode = #tpu.pipeline_mode<synchronous>, transform_indices = @transform_1, window_bounds = array<i64: 16, 32>}, {pipeline_mode = #tpu.pipeline_mode<synchronous>, transform_indices = @transform_2, window_bounds = array<i64: 16, 32>}, {pipeline_mode = #tpu.pipeline_mode<synchronous>, transform_indices = @transform_3, window_bounds = array<i64: 16, 32>}, {pipeline_mode = #tpu.pipeline_mode<synchronous>, transform_indices = @transform_4, window_bounds = array<i64: 16, 1>}, {pipeline_mode = #tpu.pipeline_mode<synchronous>, transform_indices = @transform_5, window_bounds = array<i64: 32, 32>}, {pipeline_mode = #tpu.pipeline_mode<synchronous>, transform_indices = @transform_6, window_bounds = array<i64: 32, 32>}, {pipeline_mode = #tpu.pipeline_mode<synchronous>, transform_indices = @transform_7, window_bounds = array<i64: 16, 32>}, {pipeline_mode = #tpu.pipeline_mode<synchronous>, transform_indices = @transform_8, window_bounds = array<i64: 1, 16>}, {pipeline_mode = #tpu.pipeline_mode<synchronous>, transform_indices = @transform_9, window_bounds = array<i64: 2, 8, 16>}]} {
    %c0 = arith.constant 0 : index
    %c0_0 = arith.constant 0 : index
    %0 = vector.load %arg1[%c0, %c0_0] : memref<16x32xf32, #tpu.memory_space<vmem>>, vector<16x32xf32>
    %cst = arith.constant 5.000000e-01 : f32
    %1 = vector.broadcast %cst : f32 to vector<16x32xf32>
    %2 = arith.mulf %0, %1 : vector<16x32xf32>
    %c0_1 = arith.constant 0 : index
    %c0_2 = arith.constant 0 : index
    %3 = vector.load %arg2[%c0_1, %c0_2] : memref<16x32xf32, #tpu.memory_space<vmem>>, vector<16x32xf32>
    %cst_3 = arith.constant 5.000000e-01 : f32
    %4 = vector.broadcast %cst_3 : f32 to vector<16x32xf32>
    %5 = arith.mulf %3, %4 : vector<16x32xf32>
    %c0_4 = arith.constant 0 : index
    %c0_5 = arith.constant 0 : index
    %6 = vector.load %arg3[%c0_4, %c0_5] : memref<16x32xf32, #tpu.memory_space<vmem>>, vector<16x32xf32>
    %c0_6 = arith.constant 0 : index
    %c0_7 = arith.constant 0 : index
    %7 = vector.load %arg4[%c0_6, %c0_7] : memref<16x32xf32, #tpu.memory_space<vmem>>, vector<16x32xf32>
    %c0_8 = arith.constant 0 : index
    %c0_9 = arith.constant 0 : index
    %8 = vector.load %arg5[%c0_8, %c0_9] : memref<16x1xf32, #tpu.memory_space<vmem>>, vector<16x1xf32>
    %c0_10 = arith.constant 0 : index
    %c0_11 = arith.constant 0 : index
    %9 = vector.load %arg6[%c0_10, %c0_11] : memref<32x32xf32, #tpu.memory_space<vmem>>, vector<32x32xf32>
    %c0_12 = arith.constant 0 : index
    %c0_13 = arith.constant 0 : index
    %10 = vector.load %arg7[%c0_12, %c0_13] : memref<32x32xf32, #tpu.memory_space<vmem>>, vector<32x32xf32>
    %c0_14 = arith.constant 0 : index
    %c0_15 = arith.constant 0 : index
    %11 = vector.load %arg8[%c0_14, %c0_15] : memref<16x32xf32, #tpu.memory_space<vmem>>, vector<16x32xf32>
    %c0_16 = arith.constant 0 : index
    %c0_17 = arith.constant 0 : index
    %12 = vector.load %arg9[%c0_16, %c0_17] : memref<1x16xf32, #tpu.memory_space<vmem>>, vector<1x16xf32>
    %cst_18 = arith.constant dense<0.000000e+00> : vector<16x32xf32>
    %13 = tpu.matmul %7, %10, %cst_18 {dimension_numbers = #tpu.dot_dimension_numbers<[1], [0], [0], [1], [0, 0, 1, 1], [], []>} : vector<16x32xf32>, vector<32x32xf32>, vector<16x32xf32> -> vector<16x32xf32>
    %cst_19 = arith.constant dense<0.000000e+00> : vector<16x32xf32>
    %14 = tpu.matmul %2, %9, %cst_19 {dimension_numbers = #tpu.dot_dimension_numbers<[1], [0], [0], [1], [0, 0, 1, 1], [], []>} : vector<16x32xf32>, vector<32x32xf32>, vector<16x32xf32> -> vector<16x32xf32>
    %15 = arith.addf %14, %13 : vector<16x32xf32>
    %cst_20 = arith.constant dense<0.000000e+00> : vector<16x32xf32>
    %16 = tpu.matmul %5, %9, %cst_20 {dimension_numbers = #tpu.dot_dimension_numbers<[1], [0], [0], [1], [0, 0, 1, 1], [], []>} : vector<16x32xf32>, vector<32x32xf32>, vector<16x32xf32> -> vector<16x32xf32>
    %17 = arith.addf %16, %13 : vector<16x32xf32>
    %18 = vector.shape_cast %17 : vector<16x32xf32> to vector<1x16x32xf32>
    %cst_21 = arith.constant dense<0xFF800000> : vector<1xf32>
    %19 = vector.multi_reduction <maximumf>, %18, %cst_21 [1, 2] : vector<1x16x32xf32> to vector<1xf32>
    %20 = vector.shape_cast %19 : vector<1xf32> to vector<1x1x1xf32>
    %21 = vector.extract %20[0, 0, 0] : f32 from vector<1x1x1xf32>
    %22 = vector.extract_strided_slice %2 {offsets = [0, 0], sizes = [16, 16], strides = [1, 1]} : vector<16x32xf32> to vector<16x16xf32>
    %23 = vector.extract_strided_slice %5 {offsets = [0, 0], sizes = [16, 16], strides = [1, 1]} : vector<16x32xf32> to vector<16x16xf32>
    %24 = vector.extract_strided_slice %7 {offsets = [0, 0], sizes = [16, 16], strides = [1, 1]} : vector<16x32xf32> to vector<16x16xf32>
    %25 = arith.mulf %24, %24 : vector<16x16xf32>
    %cst_22 = arith.constant dense<0.000000e+00> : vector<16xf32>
    %26 = vector.multi_reduction <add>, %25, %cst_22 [1] : vector<16x16xf32> to vector<16xf32>
    %27 = vector.shape_cast %26 : vector<16xf32> to vector<16x1xf32>
    %28 = arith.mulf %22, %22 : vector<16x16xf32>
    %cst_23 = arith.constant dense<0.000000e+00> : vector<16xf32>
    %29 = vector.multi_reduction <add>, %28, %cst_23 [1] : vector<16x16xf32> to vector<16xf32>
    %30 = vector.shape_cast %29 : vector<16xf32> to vector<16x1xf32>
    %31 = arith.addf %30, %27 : vector<16x1xf32>
    %cst_24 = arith.constant 5.000000e-01 : f32
    %32 = vector.broadcast %cst_24 : f32 to vector<16x1xf32>
    %33 = arith.mulf %32, %31 : vector<16x1xf32>
    %34 = arith.mulf %23, %23 : vector<16x16xf32>
    %cst_25 = arith.constant dense<0.000000e+00> : vector<16xf32>
    %35 = vector.multi_reduction <add>, %34, %cst_25 [1] : vector<16x16xf32> to vector<16xf32>
    %36 = vector.shape_cast %35 : vector<16xf32> to vector<16x1xf32>
    %37 = arith.addf %36, %27 : vector<16x1xf32>
    %cst_26 = arith.constant 5.000000e-01 : f32
    %38 = vector.broadcast %cst_26 : f32 to vector<16x1xf32>
    %39 = arith.mulf %38, %37 : vector<16x1xf32>
    %40 = vector.extract_strided_slice %15 {offsets = [0, 0], sizes = [16, 16], strides = [1, 1]} : vector<16x32xf32> to vector<16x16xf32>
    %41 = vector.extract_strided_slice %17 {offsets = [0, 0], sizes = [16, 16], strides = [1, 1]} : vector<16x32xf32> to vector<16x16xf32>
    %42 = vector.broadcast %33 : vector<16x1xf32> to vector<16x16xf32>
    %43 = arith.subf %40, %42 : vector<16x16xf32>
    %cst_27 = arith.constant dense<0xFF800000> : vector<16xf32>
    %44 = vector.multi_reduction <maximumf>, %40, %cst_27 [1] : vector<16x16xf32> to vector<16xf32>
    %45 = vector.shape_cast %44 : vector<16xf32> to vector<16x1xf32>
    %46 = vector.broadcast %45 : vector<16x1xf32> to vector<16x16xf32>
    %47 = arith.subf %43, %46 : vector<16x16xf32>
    %48 = math.exp %47 : vector<16x16xf32>
    %cst_28 = arith.constant 9.99999997E-7 : f32
    %49 = vector.broadcast %cst_28 : f32 to vector<16x16xf32>
    %50 = arith.addf %48, %49 : vector<16x16xf32>
    %cst_29 = arith.constant 2.500000e-01 : f32
    %51 = vector.broadcast %cst_29 : f32 to vector<16x16xf32>
    %52 = arith.mulf %51, %50 : vector<16x16xf32>
    %53 = vector.broadcast %39 : vector<16x1xf32> to vector<16x16xf32>
    %54 = arith.subf %41, %53 : vector<16x16xf32>
    %55 = vector.broadcast %21 : f32 to vector<16x16xf32>
    %56 = arith.subf %54, %55 : vector<16x16xf32>
    %57 = math.exp %56 : vector<16x16xf32>
    %cst_30 = arith.constant 9.99999997E-7 : f32
    %58 = vector.broadcast %cst_30 : f32 to vector<16x16xf32>
    %59 = arith.addf %57, %58 : vector<16x16xf32>
    %cst_31 = arith.constant 2.500000e-01 : f32
    %60 = vector.broadcast %cst_31 : f32 to vector<16x16xf32>
    %61 = arith.mulf %60, %59 : vector<16x16xf32>
    %62 = vector.broadcast %8 : vector<16x1xf32> to vector<16x16xf32>
    %63 = arith.mulf %61, %62 : vector<16x16xf32>
    %64 = vector.extract_strided_slice %2 {offsets = [0, 16], sizes = [16, 16], strides = [1, 1]} : vector<16x32xf32> to vector<16x16xf32>
    %65 = vector.extract_strided_slice %5 {offsets = [0, 16], sizes = [16, 16], strides = [1, 1]} : vector<16x32xf32> to vector<16x16xf32>
    %66 = vector.extract_strided_slice %7 {offsets = [0, 16], sizes = [16, 16], strides = [1, 1]} : vector<16x32xf32> to vector<16x16xf32>
    %67 = arith.mulf %66, %66 : vector<16x16xf32>
    %cst_32 = arith.constant dense<0.000000e+00> : vector<16xf32>
    %68 = vector.multi_reduction <add>, %67, %cst_32 [1] : vector<16x16xf32> to vector<16xf32>
    %69 = vector.shape_cast %68 : vector<16xf32> to vector<16x1xf32>
    %70 = arith.mulf %64, %64 : vector<16x16xf32>
    %cst_33 = arith.constant dense<0.000000e+00> : vector<16xf32>
    %71 = vector.multi_reduction <add>, %70, %cst_33 [1] : vector<16x16xf32> to vector<16xf32>
    %72 = vector.shape_cast %71 : vector<16xf32> to vector<16x1xf32>
    %73 = arith.addf %72, %69 : vector<16x1xf32>
    %cst_34 = arith.constant 5.000000e-01 : f32
    %74 = vector.broadcast %cst_34 : f32 to vector<16x1xf32>
    %75 = arith.mulf %74, %73 : vector<16x1xf32>
    %76 = arith.mulf %65, %65 : vector<16x16xf32>
    %cst_35 = arith.constant dense<0.000000e+00> : vector<16xf32>
    %77 = vector.multi_reduction <add>, %76, %cst_35 [1] : vector<16x16xf32> to vector<16xf32>
    %78 = vector.shape_cast %77 : vector<16xf32> to vector<16x1xf32>
    %79 = arith.addf %78, %69 : vector<16x1xf32>
    %cst_36 = arith.constant 5.000000e-01 : f32
    %80 = vector.broadcast %cst_36 : f32 to vector<16x1xf32>
    %81 = arith.mulf %80, %79 : vector<16x1xf32>
    %82 = vector.extract_strided_slice %15 {offsets = [0, 16], sizes = [16, 16], strides = [1, 1]} : vector<16x32xf32> to vector<16x16xf32>
    %83 = vector.extract_strided_slice %17 {offsets = [0, 16], sizes = [16, 16], strides = [1, 1]} : vector<16x32xf32> to vector<16x16xf32>
    %84 = vector.broadcast %75 : vector<16x1xf32> to vector<16x16xf32>
    %85 = arith.subf %82, %84 : vector<16x16xf32>
    %cst_37 = arith.constant dense<0xFF800000> : vector<16xf32>
    %86 = vector.multi_reduction <maximumf>, %82, %cst_37 [1] : vector<16x16xf32> to vector<16xf32>
    %87 = vector.shape_cast %86 : vector<16xf32> to vector<16x1xf32>
    %88 = vector.broadcast %87 : vector<16x1xf32> to vector<16x16xf32>
    %89 = arith.subf %85, %88 : vector<16x16xf32>
    %90 = math.exp %89 : vector<16x16xf32>
    %cst_38 = arith.constant 9.99999997E-7 : f32
    %91 = vector.broadcast %cst_38 : f32 to vector<16x16xf32>
    %92 = arith.addf %90, %91 : vector<16x16xf32>
    %cst_39 = arith.constant 2.500000e-01 : f32
    %93 = vector.broadcast %cst_39 : f32 to vector<16x16xf32>
    %94 = arith.mulf %93, %92 : vector<16x16xf32>
    %95 = vector.broadcast %81 : vector<16x1xf32> to vector<16x16xf32>
    %96 = arith.subf %83, %95 : vector<16x16xf32>
    %97 = vector.broadcast %21 : f32 to vector<16x16xf32>
    %98 = arith.subf %96, %97 : vector<16x16xf32>
    %99 = math.exp %98 : vector<16x16xf32>
    %cst_40 = arith.constant 9.99999997E-7 : f32
    %100 = vector.broadcast %cst_40 : f32 to vector<16x16xf32>
    %101 = arith.addf %99, %100 : vector<16x16xf32>
    %cst_41 = arith.constant 2.500000e-01 : f32
    %102 = vector.broadcast %cst_41 : f32 to vector<16x16xf32>
    %103 = arith.mulf %102, %101 : vector<16x16xf32>
    %104 = vector.broadcast %8 : vector<16x1xf32> to vector<16x16xf32>
    %105 = arith.mulf %103, %104 : vector<16x16xf32>
    %cst_42 = arith.constant 0.000000e+00 : f32
    %106 = vector.broadcast %cst_42 : f32 to vector<8x16xf32>
    %107 = vector.extract_strided_slice %52 {offsets = [0, 0], sizes = [8, 16], strides = [1, 1]} : vector<16x16xf32> to vector<8x16xf32>
    %108 = vector.extract_strided_slice %63 {offsets = [0, 0], sizes = [8, 16], strides = [1, 1]} : vector<16x16xf32> to vector<8x16xf32>
    %109 = vector.extract_strided_slice %6 {offsets = [0, 0], sizes = [8, 16], strides = [1, 1]} : vector<16x32xf32> to vector<8x16xf32>
    %cst_43 = arith.constant dense<0.000000e+00> : vector<16xf32>
    %110 = vector.multi_reduction <add>, %108, %cst_43 [0] : vector<8x16xf32> to vector<16xf32>
    %111 = vector.shape_cast %110 : vector<16xf32> to vector<1x16xf32>
    %112 = vector.broadcast %111 : vector<1x16xf32> to vector<8x16xf32>
    %113 = arith.mulf %107, %112 : vector<8x16xf32>
    %cst_44 = arith.constant dense<0.000000e+00> : vector<8xf32>
    %114 = vector.multi_reduction <add>, %113, %cst_44 [1] : vector<8x16xf32> to vector<8xf32>
    %115 = vector.shape_cast %114 : vector<8xf32> to vector<8x1xf32>
    "tpu.trace_start"() <{level = 10 : i32, message = "nm,nd->md"}> : () -> ()
    %cst_45 = arith.constant dense<0.000000e+00> : vector<16x16xf32>
    %116 = tpu.matmul %108, %109, %cst_45 {dimension_numbers = #tpu.dot_dimension_numbers<[0], [0], [1], [1], [0, 1, 1, 1], [], []>} : vector<8x16xf32>, vector<8x16xf32>, vector<16x16xf32> -> vector<16x16xf32>
    "tpu.trace_stop"() : () -> ()
    "tpu.trace_start"() <{level = 10 : i32, message = "nm,md->nd"}> : () -> ()
    %cst_46 = arith.constant dense<0.000000e+00> : vector<8x16xf32>
    %117 = tpu.matmul %107, %116, %cst_46 {dimension_numbers = #tpu.dot_dimension_numbers<[1], [0], [0], [1], [0, 0, 1, 1], [], []>} : vector<8x16xf32>, vector<16x16xf32>, vector<8x16xf32> -> vector<8x16xf32>
    "tpu.trace_stop"() : () -> ()
    %cst_47 = arith.constant 9.99999997E-7 : f32
    %118 = vector.broadcast %cst_47 : f32 to vector<8x1xf32>
    %119 = arith.addf %115, %118 : vector<8x1xf32>
    %120 = tpu.reciprocal %119 {approx = true} : vector<8x1xf32> -> vector<8x1xf32>
    %121 = vector.broadcast %120 : vector<8x1xf32> to vector<8x16xf32>
    %122 = arith.mulf %117, %121 : vector<8x16xf32>
    %123 = vector.extract_strided_slice %11 {offsets = [0, 0], sizes = [16, 16], strides = [1, 1]} : vector<16x32xf32> to vector<16x16xf32>
    "tpu.trace_start"() <{level = 10 : i32, message = "nd,od->no"}> : () -> ()
    %cst_48 = arith.constant dense<0.000000e+00> : vector<8x16xf32>
    %124 = tpu.matmul %122, %123, %cst_48 {dimension_numbers = #tpu.dot_dimension_numbers<[1], [1], [0], [0], [0, 0, 1, 0], [], []>} : vector<8x16xf32>, vector<16x16xf32>, vector<8x16xf32> -> vector<8x16xf32>
    "tpu.trace_stop"() : () -> ()
    %125 = arith.addf %106, %124 : vector<8x16xf32>
    %126 = vector.extract_strided_slice %94 {offsets = [0, 0], sizes = [8, 16], strides = [1, 1]} : vector<16x16xf32> to vector<8x16xf32>
    %127 = vector.extract_strided_slice %105 {offsets = [0, 0], sizes = [8, 16], strides = [1, 1]} : vector<16x16xf32> to vector<8x16xf32>
    %128 = vector.extract_strided_slice %6 {offsets = [0, 16], sizes = [8, 16], strides = [1, 1]} : vector<16x32xf32> to vector<8x16xf32>
    %cst_49 = arith.constant dense<0.000000e+00> : vector<16xf32>
    %129 = vector.multi_reduction <add>, %127, %cst_49 [0] : vector<8x16xf32> to vector<16xf32>
    %130 = vector.shape_cast %129 : vector<16xf32> to vector<1x16xf32>
    %131 = vector.broadcast %130 : vector<1x16xf32> to vector<8x16xf32>
    %132 = arith.mulf %126, %131 : vector<8x16xf32>
    %cst_50 = arith.constant dense<0.000000e+00> : vector<8xf32>
    %133 = vector.multi_reduction <add>, %132, %cst_50 [1] : vector<8x16xf32> to vector<8xf32>
    %134 = vector.shape_cast %133 : vector<8xf32> to vector<8x1xf32>
    "tpu.trace_start"() <{level = 10 : i32, message = "nm,nd->md"}> : () -> ()
    %cst_51 = arith.constant dense<0.000000e+00> : vector<16x16xf32>
    %135 = tpu.matmul %127, %128, %cst_51 {dimension_numbers = #tpu.dot_dimension_numbers<[0], [0], [1], [1], [0, 1, 1, 1], [], []>} : vector<8x16xf32>, vector<8x16xf32>, vector<16x16xf32> -> vector<16x16xf32>
    "tpu.trace_stop"() : () -> ()
    "tpu.trace_start"() <{level = 10 : i32, message = "nm,md->nd"}> : () -> ()
    %cst_52 = arith.constant dense<0.000000e+00> : vector<8x16xf32>
    %136 = tpu.matmul %126, %135, %cst_52 {dimension_numbers = #tpu.dot_dimension_numbers<[1], [0], [0], [1], [0, 0, 1, 1], [], []>} : vector<8x16xf32>, vector<16x16xf32>, vector<8x16xf32> -> vector<8x16xf32>
    "tpu.trace_stop"() : () -> ()
    %cst_53 = arith.constant 9.99999997E-7 : f32
    %137 = vector.broadcast %cst_53 : f32 to vector<8x1xf32>
    %138 = arith.addf %134, %137 : vector<8x1xf32>
    %139 = tpu.reciprocal %138 {approx = true} : vector<8x1xf32> -> vector<8x1xf32>
    %140 = vector.broadcast %139 : vector<8x1xf32> to vector<8x16xf32>
    %141 = arith.mulf %136, %140 : vector<8x16xf32>
    %142 = vector.extract_strided_slice %11 {offsets = [0, 16], sizes = [16, 16], strides = [1, 1]} : vector<16x32xf32> to vector<16x16xf32>
    "tpu.trace_start"() <{level = 10 : i32, message = "nd,od->no"}> : () -> ()
    %cst_54 = arith.constant dense<0.000000e+00> : vector<8x16xf32>
    %143 = tpu.matmul %141, %142, %cst_54 {dimension_numbers = #tpu.dot_dimension_numbers<[1], [1], [0], [0], [0, 0, 1, 0], [], []>} : vector<8x16xf32>, vector<16x16xf32>, vector<8x16xf32> -> vector<8x16xf32>
    "tpu.trace_stop"() : () -> ()
    %144 = arith.addf %125, %143 : vector<8x16xf32>
    %145 = vector.broadcast %12 : vector<1x16xf32> to vector<8x16xf32>
    %146 = arith.addf %144, %145 : vector<8x16xf32>
    %c0_55 = arith.constant 0 : index
    %c0_56 = arith.constant 0 : index
    %c0_57 = arith.constant 0 : index
    %147 = vector.load %arg10[%c0_55, %c0_56, %c0_57] : memref<2x8x16xf32, #tpu.memory_space<vmem>>, vector<1x8x16xf32>
    %148 = vector.shape_cast %147 : vector<1x8x16xf32> to vector<8x16xf32>
    %149 = vector.shape_cast %146 : vector<8x16xf32> to vector<1x8x16xf32>
    tpu.vector_store %arg10[%c0_55, %c0_56, %c0_57], %149 {strides = array<i32>} : memref<2x8x16xf32, #tpu.memory_space<vmem>>, vector<1x8x16xf32>,
    %cst_58 = arith.constant 0.000000e+00 : f32
    %150 = vector.broadcast %cst_58 : f32 to vector<8x16xf32>
    %151 = vector.extract_strided_slice %52 {offsets = [8, 0], sizes = [8, 16], strides = [1, 1]} : vector<16x16xf32> to vector<8x16xf32>
    %152 = vector.extract_strided_slice %63 {offsets = [8, 0], sizes = [8, 16], strides = [1, 1]} : vector<16x16xf32> to vector<8x16xf32>
    %153 = vector.extract_strided_slice %6 {offsets = [8, 0], sizes = [8, 16], strides = [1, 1]} : vector<16x32xf32> to vector<8x16xf32>
    %cst_59 = arith.constant dense<0.000000e+00> : vector<16xf32>
    %154 = vector.multi_reduction <add>, %152, %cst_59 [0] : vector<8x16xf32> to vector<16xf32>
    %155 = vector.shape_cast %154 : vector<16xf32> to vector<1x16xf32>
    %156 = vector.broadcast %155 : vector<1x16xf32> to vector<8x16xf32>
    %157 = arith.mulf %151, %156 : vector<8x16xf32>
    %cst_60 = arith.constant dense<0.000000e+00> : vector<8xf32>
    %158 = vector.multi_reduction <add>, %157, %cst_60 [1] : vector<8x16xf32> to vector<8xf32>
    %159 = vector.shape_cast %158 : vector<8xf32> to vector<8x1xf32>
    "tpu.trace_start"() <{level = 10 : i32, message = "nm,nd->md"}> : () -> ()
    %cst_61 = arith.constant dense<0.000000e+00> : vector<16x16xf32>
    %160 = tpu.matmul %152, %153, %cst_61 {dimension_numbers = #tpu.dot_dimension_numbers<[0], [0], [1], [1], [0, 1, 1, 1], [], []>} : vector<8x16xf32>, vector<8x16xf32>, vector<16x16xf32> -> vector<16x16xf32>
    "tpu.trace_stop"() : () -> ()
    "tpu.trace_start"() <{level = 10 : i32, message = "nm,md->nd"}> : () -> ()
    %cst_62 = arith.constant dense<0.000000e+00> : vector<8x16xf32>
    %161 = tpu.matmul %151, %160, %cst_62 {dimension_numbers = #tpu.dot_dimension_numbers<[1], [0], [0], [1], [0, 0, 1, 1], [], []>} : vector<8x16xf32>, vector<16x16xf32>, vector<8x16xf32> -> vector<8x16xf32>
    "tpu.trace_stop"() : () -> ()
    %cst_63 = arith.constant 9.99999997E-7 : f32
    %162 = vector.broadcast %cst_63 : f32 to vector<8x1xf32>
    %163 = arith.addf %159, %162 : vector<8x1xf32>
    %164 = tpu.reciprocal %163 {approx = true} : vector<8x1xf32> -> vector<8x1xf32>
    %165 = vector.broadcast %164 : vector<8x1xf32> to vector<8x16xf32>
    %166 = arith.mulf %161, %165 : vector<8x16xf32>
    %167 = vector.extract_strided_slice %11 {offsets = [0, 0], sizes = [16, 16], strides = [1, 1]} : vector<16x32xf32> to vector<16x16xf32>
    "tpu.trace_start"() <{level = 10 : i32, message = "nd,od->no"}> : () -> ()
    %cst_64 = arith.constant dense<0.000000e+00> : vector<8x16xf32>
    %168 = tpu.matmul %166, %167, %cst_64 {dimension_numbers = #tpu.dot_dimension_numbers<[1], [1], [0], [0], [0, 0, 1, 0], [], []>} : vector<8x16xf32>, vector<16x16xf32>, vector<8x16xf32> -> vector<8x16xf32>
    "tpu.trace_stop"() : () -> ()
    %169 = arith.addf %150, %168 : vector<8x16xf32>
    %170 = vector.extract_strided_slice %94 {offsets = [8, 0], sizes = [8, 16], strides = [1, 1]} : vector<16x16xf32> to vector<8x16xf32>
    %171 = vector.extract_strided_slice %105 {offsets = [8, 0], sizes = [8, 16], strides = [1, 1]} : vector<16x16xf32> to vector<8x16xf32>
    %172 = vector.extract_strided_slice %6 {offsets = [8, 16], sizes = [8, 16], strides = [1, 1]} : vector<16x32xf32> to vector<8x16xf32>
    %cst_65 = arith.constant dense<0.000000e+00> : vector<16xf32>
    %173 = vector.multi_reduction <add>, %171, %cst_65 [0] : vector<8x16xf32> to vector<16xf32>
    %174 = vector.shape_cast %173 : vector<16xf32> to vector<1x16xf32>
    %175 = vector.broadcast %174 : vector<1x16xf32> to vector<8x16xf32>
    %176 = arith.mulf %170, %175 : vector<8x16xf32>
    %cst_66 = arith.constant dense<0.000000e+00> : vector<8xf32>
    %177 = vector.multi_reduction <add>, %176, %cst_66 [1] : vector<8x16xf32> to vector<8xf32>
    %178 = vector.shape_cast %177 : vector<8xf32> to vector<8x1xf32>
    "tpu.trace_start"() <{level = 10 : i32, message = "nm,nd->md"}> : () -> ()
    %cst_67 = arith.constant dense<0.000000e+00> : vector<16x16xf32>
    %179 = tpu.matmul %171, %172, %cst_67 {dimension_numbers = #tpu.dot_dimension_numbers<[0], [0], [1], [1], [0, 1, 1, 1], [], []>} : vector<8x16xf32>, vector<8x16xf32>, vector<16x16xf32> -> vector<16x16xf32>
    "tpu.trace_stop"() : () -> ()
    "tpu.trace_start"() <{level = 10 : i32, message = "nm,md->nd"}> : () -> ()
    %cst_68 = arith.constant dense<0.000000e+00> : vector<8x16xf32>
    %180 = tpu.matmul %170, %179, %cst_68 {dimension_numbers = #tpu.dot_dimension_numbers<[1], [0], [0], [1], [0, 0, 1, 1], [], []>} : vector<8x16xf32>, vector<16x16xf32>, vector<8x16xf32> -> vector<8x16xf32>
    "tpu.trace_stop"() : () -> ()
    %cst_69 = arith.constant 9.99999997E-7 : f32
    %181 = vector.broadcast %cst_69 : f32 to vector<8x1xf32>
    %182 = arith.addf %178, %181 : vector<8x1xf32>
    %183 = tpu.reciprocal %182 {approx = true} : vector<8x1xf32> -> vector<8x1xf32>
    %184 = vector.broadcast %183 : vector<8x1xf32> to vector<8x16xf32>
    %185 = arith.mulf %180, %184 : vector<8x16xf32>
    %186 = vector.extract_strided_slice %11 {offsets = [0, 16], sizes = [16, 16], strides = [1, 1]} : vector<16x32xf32> to vector<16x16xf32>
    "tpu.trace_start"() <{level = 10 : i32, message = "nd,od->no"}> : () -> ()
    %cst_70 = arith.constant dense<0.000000e+00> : vector<8x16xf32>
    %187 = tpu.matmul %185, %186, %cst_70 {dimension_numbers = #tpu.dot_dimension_numbers<[1], [1], [0], [0], [0, 0, 1, 0], [], []>} : vector<8x16xf32>, vector<16x16xf32>, vector<8x16xf32> -> vector<8x16xf32>
    "tpu.trace_stop"() : () -> ()
    %188 = arith.addf %169, %187 : vector<8x16xf32>
    %189 = vector.broadcast %12 : vector<1x16xf32> to vector<8x16xf32>
    %190 = arith.addf %188, %189 : vector<8x16xf32>
    %c1 = arith.constant 1 : index
    %c0_71 = arith.constant 0 : index
    %c0_72 = arith.constant 0 : index
    %191 = vector.load %arg10[%c1, %c0_71, %c0_72] : memref<2x8x16xf32, #tpu.memory_space<vmem>>, vector<1x8x16xf32>
    %192 = vector.shape_cast %191 : vector<1x8x16xf32> to vector<8x16xf32>
    %193 = vector.shape_cast %190 : vector<8x16xf32> to vector<1x8x16xf32>
    tpu.vector_store %arg10[%c1, %c0_71, %c0_72], %193 {strides = array<i32>} : memref<2x8x16xf32, #tpu.memory_space<vmem>>, vector<1x8x16xf32>,
    return
  }
  func.func @transform_0(%arg0: i32) -> (i32, i32) {
    %c0_i32 = arith.constant 0 : i32
    %c0_i32_0 = arith.constant 0 : i32
    %c0_i32_1 = arith.constant 0 : i32
    return %c0_i32, %c0_i32_0 : i32, i32
  }
  func.func @transform_1(%arg0: i32) -> (i32, i32) {
    %c0_i32 = arith.constant 0 : i32
    %c0_i32_0 = arith.constant 0 : i32
    %c0_i32_1 = arith.constant 0 : i32
    return %c0_i32, %c0_i32_0 : i32, i32
  }
  func.func @transform_2(%arg0: i32) -> (i32, i32) {
    %c0_i32 = arith.constant 0 : i32
    %c0_i32_0 = arith.constant 0 : i32
    %c0_i32_1 = arith.constant 0 : i32
    return %c0_i32, %c0_i32_0 : i32, i32
  }
  func.func @transform_3(%arg0: i32) -> (i32, i32) {
    %c0_i32 = arith.constant 0 : i32
    %c0_i32_0 = arith.constant 0 : i32
    %c0_i32_1 = arith.constant 0 : i32
    return %c0_i32, %c0_i32_0 : i32, i32
  }
  func.func @transform_4(%arg0: i32) -> (i32, i32) {
    %c0_i32 = arith.constant 0 : i32
    %c0_i32_0 = arith.constant 0 : i32
    %c0_i32_1 = arith.constant 0 : i32
    return %c0_i32, %c0_i32_0 : i32, i32
  }
  func.func @transform_5(%arg0: i32) -> (i32, i32) {
    %c0_i32 = arith.constant 0 : i32
    %c0_i32_0 = arith.constant 0 : i32
    %c0_i32_1 = arith.constant 0 : i32
    return %c0_i32, %c0_i32_0 : i32, i32
  }
  func.func @transform_6(%arg0: i32) -> (i32, i32) {
    %c0_i32 = arith.constant 0 : i32
    %c0_i32_0 = arith.constant 0 : i32
    %c0_i32_1 = arith.constant 0 : i32
    return %c0_i32, %c0_i32_0 : i32, i32
  }
  func.func @transform_7(%arg0: i32) -> (i32, i32) {
    %c0_i32 = arith.constant 0 : i32
    %c0_i32_0 = arith.constant 0 : i32
    %c0_i32_1 = arith.constant 0 : i32
    return %c0_i32, %c0_i32_0 : i32, i32
  }
  func.func @transform_8(%arg0: i32) -> (i32, i32) {
    %c0_i32 = arith.constant 0 : i32
    %c0_i32_0 = arith.constant 0 : i32
    %c0_i32_1 = arith.constant 0 : i32
    return %c0_i32, %c0_i32_0 : i32, i32
  }
  func.func @transform_9(%arg0: i32) -> (i32, i32, i32) {
    %c0_i32 = arith.constant 0 : i32
    %c0_i32_0 = arith.constant 0 : i32
    %c0_i32_1 = arith.constant 0 : i32
    %c0_i32_2 = arith.constant 0 : i32
    return %c0_i32, %c0_i32_0, %c0_i32_1 : i32, i32, i32
  }
}

</mosaic_0001>

<bundles_post_ra>
// kernel: flt_attention_forward.1
= control target key start
LH: loop header
LB: loop body
LE: loop exit
PB: predicated region body
PF: predicated region fallthrough
CT: control target
= control target key end

     0   :  { %vm58_vm0 = vcmask 261120   ;;  %s2265_s0 = inlined_call_operand.vmem [shape: f32[16,32], index: 0, kind: input, shape index: {}]   ;;  %s2266_s1 = inlined_call_operand.vmem [shape: f32[16,32], index: 1, kind: input, shape index: {}]   ;;  %s2267_s2 = inlined_call_operand.vmem [shape: f32[16,32], index: 2, kind: input, shape index: {}]   ;;  %s2268_s3 = inlined_call_operand.vmem [shape: f32[16,32], index: 3, kind: input, shape index: {}]   ;;  %s2269_s4 = inlined_call_operand.vmem [shape: f32[16,1], index: 4, kind: input, shape index: {}]   ;;  %s2270_s5 = inlined_call_operand.vmem [shape: f32[32,32], index: 5, kind: input, shape index: {}]   ;;  %s2271_s6 = inlined_call_operand.vmem [shape: f32[32,32], index: 6, kind: input, shape index: {}]   ;;  %s2272_s7 = inlined_call_operand.vmem [shape: f32[16,32], index: 7, kind: input, shape index: {}]   ;;  %s2273_s8 = inlined_call_operand.vmem [shape: f32[1,16], index: 8, kind: input, shape index: {}]   ;;  %s2274_s9 = inlined_call_operand.hbm [shape: f32[2,8,16], index: 9, kind: output, shape index: {}]  }
   0x1   :  { %v51_v0 = vld [vmem:[%s2271_s6] sm:$0xff]  ;;  %v52_v1 = vld [vmem:[%s2271_s6 + $0x8] sm:$0xff]  ;;  %v53_v5 = vld [vmem:[%s2271_s6 + $0x10] sm:$0xff] }
   0x2   :  { %v47_v2 = vld [vmem:[%s2270_s5] sm:$0xff]  ;;  %v1829_v3 = vpack.c.bf16 %v52_v1, %v51_v0  ;;  %v48_v4 = vld [vmem:[%s2270_s5 + $0x8] sm:$0xff]  ;;  %v54_v6 = vld [vmem:[%s2271_s6 + $0x18] sm:$0xff] }
   0x3   :  { %v1837_v7 = vpack.c.bf16 %v48_v4, %v47_v2  ;;  %v1833_v8 = vpack.c.bf16 %v54_v6, %v53_v5  ;;  %v49_v9 = vld [vmem:[%s2270_s5 + $0x10] sm:$0xff]  ;;  %v50_v10 = vld [vmem:[%s2270_s5 + $0x18] sm:$0xff]  ;;  %v43_v11 = vld [vmem:[%s2268_s3] sm:$0xff] }
   0x4   :  { %1830 = vmatprep.subr.bf16.mxu0 %v1829_v3  ;;  %v1841_v12 = vpack.c.bf16 %v50_v10, %v49_v9  ;;  %1728 = vmatprep.mubr.msk.f32.mxu0 %vm58_vm0, %v43_v11  ;;  %v33_v13 = vld [vmem:[%s2265_s0] sm:$0xff]  ;;  %v314_v14 = vmul.f32 %v43_v11, %v43_v11 }
   0x5   :  { %1838 = vmatprep.subr.bf16.mxu1 %v1837_v7  ;;  %1832 = vmatpush3.bf16.msra.mxu0 %v1829_v3  ;;  %v2035_v15 = vmul.f32 0.5, %v33_v13  ;;  %v37_v16 = vld [vmem:[%s2266_s1] sm:$0xff] }
   0x6   :  { %14 = vsyncpa [#allocation3], 0  ;;  %1840 = vmatpush3.bf16.msra.mxu1 %v1837_v7  ;;  %1834 = vmatprep.subr.bf16.mxu0 %v1833_v8  ;;  %v34_v17 = vld [vmem:[%s2265_s0 + $0x8] sm:$0xff]  ;;  %v39_v18 = vmul.f32 0.5, %v37_v16  ;;  %s1946_s10 = smov 112   ;;  %v1947_v24 = vmov 0  }
   0x7   :  { %1842 = vmatprep.subr.bf16.mxu1 %v1841_v12  ;;  %1739 = vmatprep.mubr.msk.f32.mxu1 %vm58_vm0, %v2035_v15  ;;  %v2049_v20 = vld [vmem:[%s2268_s3 + $0x8] sm:$0xff]  ;;  %v2051_v21 = vmul.f32 0.5, %v34_v17  ;;  %vm316_vm1 = vcmask 130048   ;;  %v45_v43 = vld [vmem:[%s2269_s4] sm:$0xff]  ;;  %v323_v13 = vmul.f32 %v2035_v15, %v2035_v15  ;;  %vm442_vm2 = vcmask 261248  }
   0x8   :  { %392 = vrot.lane.b32.xlu0 %v314_v14, %s1946_s10  ;;  %v335_v19 = vmul.f32 %v39_v18, %v39_v18  ;;  %v38_v22 = vld [vmem:[%s2266_s1 + $0x8] sm:$0xff]  ;;  %1891 = vset.pattern.permute.xlu1 %v1947_v24  ;;  %v317_v44 = vsel %vm316_vm1, %v314_v14, 0.0  ;;  %v41_v45 = vld [vmem:[%s2267_s2] sm:$0xff]  ;;  %vm516_vm3 = vcmask 64512   ;;  %vm1949_vm4 = vmmov 0   ;;  %vm2183_vm5 = vmpackc.low %vm316_vm1, %vm316_vm1 }
   0x9   :  { %1836 = vmatpush3.bf16.msra.mxu0 %v1833_v8  ;;  %v2062_v23 = vmul.f32 0.5, %v38_v22 }
   0xa   :  { %1844 = vmatpush3.bf16.msra.mxu1 %v1841_v12  ;;  %1846 = vmatprep.subr.bf16.mxu0 %v1837_v7  ;;  %v337_v28 = vsel %vm316_vm1, %v335_v19, 0.0 }
   0xb   :  { %1753 = vmatprep.subr.mxu1 %v41_v45 }
   0xc   :  { %1729 = vmatmul.mubr.msk.f32.vlgmr.msra.gmra.mrb[0].mxu0 %vm58_vm0, %v2049_v20  ;;  %424 = vrot.lane.b32.xlu0 %v335_v19, %s1946_s10 }
   0xd   :  { %1740 = vmatmul.mubr.msk.f32.vlgmr.msra.gmra.mrb[0].mxu1 %vm58_vm0, %v2051_v21  ;;  %1848 = vmatpush3.bf16.msra.mxu0 %v1837_v7 }
   0xe   :  { %1850 = vmatprep.subr.bf16.mxu0 %v1841_v12  ;;  %1750 = vmatprep.mubr.msk.f32.mxu0 %vm58_vm0, %v39_v18  ;;  %v2106_v18 = vmul.f32 %v2049_v20, %v2049_v20 }
   0xf   :  { %1754 = vmatpush3.msra.mxu1 %v41_v45 }
  0x11   :  { %1852 = vmatpush3.bf16.msra.mxu0 %v1841_v12 }
  0x14   :  { %1751 = vmatmul.mubr.msk.f32.vlgmr.msra.gmra.mrb[2].mxu0 %vm58_vm0, %v2062_v23 }
  0x7a   :  { %v393_v25 = vpop.permute.xlu0 %392 }
  0x7b   :  { %v398_v42 = vsel %vm316_vm1, %v393_v25, 0.0  ;;  %v325_v25 = vsel %vm316_vm1, %v323_v13, 0.0 }
  0x7e   :  { %v425_v26 = vpop.permute.xlu0 %424 }
  0x7f   :  { %v430_v27 = vsel %vm316_vm1, %v425_v26, 0.0 }
  0x80   :  { %431 = vadd.xlane.f32.xlu0 %v430_v27 }
  0x84   :  { %338 = vadd.xlane.f32.xlu0 %v337_v28  ;;  %v1948_v28 = vmov 0.0|0.0  }
  0x85   :  { %1853 = vmatprep.subr.bf16.mxu1 %v1948_v28 }
  0xdf   :  { %v1730_v29 = vpop.f32.mrb[0].mxu0 }
  0xe0   :  { %v1741_v30 = vpop.f32.mrb[0].mxu1  ;;  %v131_v31 = vpop.f32.mrb[1].mxu0 }
  0xe1   :  { %v2069_v32 = vadd.f32 %v1741_v30, %v1730_v29  ;;  %v212_v33 = vpop.f32.mrb[1].mxu1 }
  0xe2   :  { %v2071_v34 = vadd.f32 %v212_v33, %v131_v31 }
  0xe4   :  { %v443_v16 = vsel %vm442_vm2, %v2071_v34, -inf  ;;  %v349_v20 = vsel %vm316_vm1, %v2071_v34, -inf }
  0xe7   :  { %v1752_v35 = vpop.f32.mrb[2].mxu0 }
  0xe8   :  { %v2073_v36 = vadd.f32 %v1752_v35, %v1730_v29  ;;  %v293_v37 = vpop.f32.mrb[3].mxu0  ;;  %v1950_v29 = vmov 0.0  }
  0xe9   :  { %v294_v38 = vadd.f32 %v293_v37, %v131_v31 }
  0xea   :  { %v303_v39 = vsel %vm58_vm0, %v2073_v36, -inf }
  0xeb   :  { %v302_v40 = vsel %vm58_vm0, %v294_v38, -inf }
  0xec   :  { %v304_v41 = vmax.f32 %v302_v40, %v303_v39 }
  0xee   :  { %305 = vmax.xlane.f32.xlu1 %v304_v41 }
  0xf2   :  { %399 = vadd.xlane.f32.xlu1 %v398_v42 }
 0x103   :  { %380 = vperm.xlu1 %1891, %v45_v43  }
 0x10d   :  { %v432_v53 = vpop.xlane.xlu0 %431 }
 0x111   :  { %v339_v62 = vpop.xlane.xlu0 %338 }
 0x127   :  { %318 = vadd.xlane.f32.xlu1 %v317_v44 }
 0x138   :  { %726 = vrot.lane.b32.xlu1 %v41_v45, %s1946_s10 }
 0x17b   :  { %v306_v46 = vpop.xlane.xlu1 %305 }
 0x17c   :  { %v307_v47 = vrot.slane %v306_v46, 4 }
 0x17e   :  { %v308_v48 = vmax.f32 %v306_v46, %v307_v47 }
 0x17f   :  { %v2087_v54 = vpop.xlane.xlu1 %399 }
 0x180   :  { %v309_v49 = vrot.slane %v308_v48, 2  ;;  %v436_v55 = vadd.f32 %v432_v53, %v2087_v54 }
 0x182   :  { %v310_v50 = vmax.f32 %v308_v48, %v309_v49  ;;  %v438_v56 = vmul.f32 0.5, %v436_v55 }
 0x183   :  { %v381_v60 = vpop.permute.xlu1 %380 }
 0x184   :  { %v311_v51 = vrot.slane %v310_v50, 1  ;;  %v459_v57 = vsub.f32 %v294_v38, %v438_v56 }
 0x186   :  { %v312_v52 = vmax.f32 %v310_v50, %v311_v51 }
 0x188   :  { %1881 = vpush %v312_v52 }
 0x1b4   :  { %v319_v63 = vpop.xlane.xlu1 %318 }
 0x1b5   :  { %v343_v0 = vadd.f32 %v339_v62, %v319_v63 }
 0x1b7   :  { %v345_v1 = vmul.f32 0.5, %v343_v0 }
 0x1b8   :  { %v727_v14 = vpop.permute.xlu1 %726 }
 0x1b9   :  { %s1882_s16 = spop %1881  ;;  %v365_v4 = vsub.f32 %v294_v38, %v345_v1  ;;  %1765 = vmatprep.subr.mxu0 %v727_v14 }
 0x1ba   :  { %v2090_v58 = vstv %s1882_s16  ;;  %1766 = vmatpush3.msra.mxu0 %v727_v14 }
 0x1bb   :  { %v461_v59 = vsub.f32 %v459_v57, %v2090_v58  ;;  %v368_v7 = vsub.f32 %v365_v4, %v2090_v58  ;;  %1859 = vmatprep.subr.bf16.mxu0 %v1948_v28 }
 0x1bd   :  { %v463_v61 = vmul.f32 1.442695, %v461_v59  ;;  %v370_v8 = vmul.f32 1.442695, %v368_v7  ;;  %v336_v59 = vmul.f32 %v2062_v23, %v2062_v23 }
 0x1bf   :  { %1898 = vpow2.f32 %v463_v61 }
 0x1c0   :  { %1900 = vpow2.f32 %v370_v8 }
 0x1c9   :  { %v1899_v2 = vpop.eup %1898 }
 0x1ca   :  { %v467_v3 = vadd.f32 1e-06, %v1899_v2  ;;  %v1901_v9 = vpop.eup %1900 }
 0x1cb   :  { %v374_v10 = vadd.f32 1e-06, %v1901_v9 }
 0x1cc   :  { %v469_v5 = vmul.f32 0.25, %v467_v3 }
 0x1cd   :  { %v376_v11 = vmul.f32 0.25, %v374_v10 }
 0x1ce   :  { %v2093_v6 = vmul.f32 %v469_v5, %v381_v60 }
 0x1cf   :  { %v388_v12 = vmul.f32 %v381_v60, %v376_v11  ;;  %v320_v11 = vsel %vm316_vm1, %v2106_v18, 0.0 }
 0x1d0   :  { %690 = vrot.lane.b32.xlu0 %v2093_v6, %s1946_s10  ;;  %v674_v23 = vsel %vm442_vm2, %v2093_v6, 0.0 }
 0x1d1   :  { %v473_v37 = vsel %vm316_vm1, %v388_v12, 0.0  ;;  %v675_v1 = vrot.slane %v674_v23, 4 }
 0x1d2   :  { %v474_v43 = vrot.slane %v473_v37, 4 }
 0x1d3   :  { %v676_v3 = vadd.f32 %v675_v1, %v674_v23 }
 0x1d4   :  { %v475_v48 = vadd.f32 %v474_v43, %v473_v37 }
 0x1d5   :  { %v677_v5 = vrot.slane %v676_v3, 2 }
 0x1d6   :  { %v476_v50 = vrot.slane %v475_v48, 2 }
 0x1d7   :  { %v678_v7 = vadd.f32 %v677_v5, %v676_v3 }
 0x1d8   :  { %v477_v51 = vadd.f32 %v476_v50, %v475_v48  ;;  %v42_v50 = vld [vmem:[%s2267_s2 + $0x8] sm:$0xff] }
 0x1d9   :  { %v679_v8 = vrot.slane %v678_v7, 1 }
 0x1da   :  { %v478_v55 = vrot.slane %v477_v51, 1 }
 0x1db   :  { %v680_v9 = vadd.f32 %v679_v8, %v678_v7 }
 0x1dc   :  { %v479_v60 = vadd.f32 %v478_v55, %v477_v51 }
 0x1ee   :  { %484 = vxpose.xlu0.b32.start.end [1/1] (short) (narrow) %v388_v12, 16 }
 0x217   :  { %1892 = vset.pattern.permute.xlu0 %v1947_v24 }
 0x21b   :  { %406 = vrot.lane.b32.xlu0 %v323_v13, %s1946_s10 }
 0x23a   :  { %444 = vmax.xlane.f32.xlu0 %v443_v16 }
 0x242   :  { %v691_v17 = vpop.permute.xlu0 %690 }
 0x243   :  { %693 = vxpose.xlu1.b32.start.end [1/1] (short) (narrow) %v691_v17, 16 }
 0x250   :  { %394 = vrot.lane.b32.xlu0 %v2106_v18, %s1946_s10  ;;  %v46_v18 = vld [vmem:[%s2269_s4 + $0x8] sm:$0xff] }
 0x26e   :  { %v500_v15 = vpop.trf.xlu0 }
 0x26f   :  { %1755 = vmatprep.mubr.msk.f32.mxu1 %vm516_vm3, %v500_v15  ;;  %v340_v15 = vsel %vm316_vm1, %v336_v59, 0.0 }
 0x272   :  { %v501_v19 = vpop.trf.xlu0 }
 0x273   :  { %1756 = vmatmul.mubr.msk.f32.vlgmr.msra.gmra.mrb[2].mxu1 %vm516_vm3, %v501_v19  ;;  %v55_v19 = vld [vmem:[%s2272_s7] sm:$0xff] }
 0x274   :  { %1762 = vmatprep.mubr.msk.f32.mxu1 %vm1949_vm4, %v1950_v29 }
 0x28d   :  { %v407_v22 = vpop.permute.xlu0 %406 }
 0x28e   :  { %v412_v24 = vsel %vm316_vm1, %v407_v22, 0.0  ;;  %v56_v22 = vld [vmem:[%s2272_s7 + $0x8] sm:$0xff] }
 0x28f   :  { %413 = vadd.xlane.f32.xlu1 %v412_v24  ;;  %v1893_v24 = vpack.i.bf16 %v56_v22, %v55_v19 }
 0x293   :  { %326 = vadd.xlane.f32.xlu1 %v325_v25  ;;  %v2159_v25 = vpack.c.bf16 %v56_v22, %v55_v19 }
 0x297   :  { %350 = vmax.xlane.f32.xlu1 %v349_v20 }
 0x2c3   :  { %v709_v26 = vpop.trf.xlu1 }
 0x2c4   :  { %1767 = vmatprep.mubr.msk.f32.mxu0 %vm516_vm3, %v709_v26 }
 0x2c7   :  { %v710_v27 = vpop.trf.xlu1  ;;  %v445_v40 = vpop.xlane.xlu0 %444 }
 0x2c8   :  { %1768 = vmatmul.mubr.msk.f32.vlgmr.msra.gmra.mrb[4].mxu0 %vm516_vm3, %v710_v27 }
 0x2c9   :  { %1781 = vmatprep.mubr.msk.f32.mxu0 %vm1949_vm4, %v1950_v29 }
 0x2cb   :  { %v395_v2 = vpop.permute.xlu0 %394 }
 0x2cc   :  { %v401_v4 = vsel %vm316_vm1, %v395_v2, 0.0  ;;  %v324_v2 = vmul.f32 %v2051_v21, %v2051_v21 }
 0x31c   :  { %v414_v30 = vpop.xlane.xlu1 %413 }
 0x31d   :  { %v418_v31 = vadd.f32 %v414_v30, %v2087_v54 }
 0x31f   :  { %v420_v33 = vmul.f32 0.5, %v418_v31 }
 0x320   :  { %v327_v35 = vpop.xlane.xlu1 %326 }
 0x321   :  { %v440_v38 = vsub.f32 %v2071_v34, %v420_v33  ;;  %v331_v39 = vadd.f32 %v327_v35, %v319_v63 }
 0x323   :  { %v449_v41 = vsub.f32 %v440_v38, %v445_v40  ;;  %v333_v42 = vmul.f32 0.5, %v331_v39 }
 0x324   :  { %v351_v46 = vpop.xlane.xlu1 %350 }
 0x325   :  { %v451_v44 = vmul.f32 1.442695, %v449_v41  ;;  %v347_v45 = vsub.f32 %v2071_v34, %v333_v42 }
 0x327   :  { %1902 = vpow2.f32 %v451_v44  ;;  %v355_v47 = vsub.f32 %v347_v45, %v351_v46 }
 0x329   :  { %v357_v49 = vmul.f32 1.442695, %v355_v47 }
 0x32b   :  { %1904 = vpow2.f32 %v357_v49 }
 0x331   :  { %v1903_v52 = vpop.eup %1902 }
 0x332   :  { %v455_v53 = vadd.f32 1e-06, %v1903_v52 }
 0x334   :  { %v457_v54 = vmul.f32 0.25, %v455_v53 }
 0x335   :  { %v1905_v56 = vpop.eup %1904 }
 0x336   :  { %v361_v57 = vadd.f32 1e-06, %v1905_v56  ;;  %811 = vrot.lane.b32.xlu1 %v457_v54, %s1946_s10  ;;  %v681_v10 = vmul.f32 %v680_v9, %v457_v54 }
 0x338   :  { %v363_v34 = vmul.f32 0.25, %v361_v57 }
 0x33a   :  { %426 = vrot.lane.b32.xlu1 %v336_v59, %s1946_s10  ;;  %v2132_v61 = vmul.f32 %v479_v60, %v363_v34 }
 0x346   :  { %v1757_v62 = vpop.f32.mrb[2].mxu1 }
 0x347   :  { %v589_v63 = vpop.f32.mrb[3].mxu1 }
 0x348   :  { %v1854_v0 = vpack.c.bf16 %v1757_v62, %v589_v63 }
 0x34a   :  { %1855 = vmatpush3.bf16.msra.mxu1 %v1854_v0 }
 0x34b   :  { %1856 = vmatprep.subr.bf16.mxu1 %v1948_v28 }
 0x34d   :  { %1763 = vmatmul.mubr.msk.f32.vlgmr.msra.gmra.mrb[4].mxu1 %vm316_vm1, %v363_v34 }
 0x34e   :  { %1774 = vmatprep.mubr.msk.f32.mxu1 %vm1949_vm4, %v1950_v29 }
 0x35e   :  { %402 = vadd.xlane.f32.xlu1 %v401_v4 }
 0x36f   :  { %683 = vrot.lane.b32.xlu1 %v681_v10, %s1946_s10 }
 0x393   :  { %321 = vadd.xlane.f32.xlu1 %v320_v11 }
 0x39b   :  { %v1769_v12 = vpop.f32.mrb[4].mxu0 }
 0x39c   :  { %v801_v13 = vpop.f32.mrb[5].mxu0 }
 0x39d   :  { %v1857_v6 = vpack.c.bf16 %v1769_v12, %v801_v13  ;;  %v328_v12 = vsel %vm316_vm1, %v324_v2, 0.0 }
 0x39f   :  { %1858 = vmatpush3.bf16.msra.mxu1 %v1857_v6  ;;  %v352_v6 = vsel %vm316_vm1, %v2069_v32, -inf }
 0x3a0   :  { %1863 = vmatprep.subr.bf16.mxu1 %v1948_v28 }
 0x3a8   :  { %v812_v14 = vpop.permute.xlu1 %811 }
 0x3a9   :  { %1775 = vmatmul.mubr.msk.f32.vlgmr.msra.gmra.mrb[6].mxu1 %vm316_vm1, %v812_v14  ;;  %v481_v14 = vsel %vm316_vm1, %v2132_v61, 0.0 }
 0x3aa   :  { %1788 = vmatprep.mubr.msk.f32.mxu1 %vm1949_vm4, %v1950_v29  ;;  %1866 = vmatpush3.bf16.xpose.msk.msra.mxu1 %vm2183_vm5, %v2159_v25 }
 0x3ab   :  { %1867 = vmatprep.subr.bf16.mxu1 %v1948_v28 }
 0x3ac   :  { %v427_v16 = vpop.permute.xlu1 %426 }
 0x3ad   :  { %v433_v17 = vsel %vm316_vm1, %v427_v16, 0.0 }
 0x3ae   :  { %434 = vadd.xlane.f32.xlu0 %v433_v17 }
 0x3c4   :  { %385 = vperm.xlu0 %1892, %v46_v18  }
 0x3e3   :  { %341 = vadd.xlane.f32.xlu0 %v340_v15 }
 0x3eb   :  { %v2164_v27 = vpop.xlane.xlu1 %402 }
 0x3ef   :  { %v684_v44 = vpop.permute.xlu1 %683 }
 0x3f0   :  { %v686_v45 = vsel %vm316_vm1, %v684_v44, 0.0 }
 0x3f9   :  { %1894 = vrot.lane.b32.xlu0 %v1893_v24, %s1946_s10 }
 0x420   :  { %v2162_v20 = vpop.f32.mrb[4].mxu1  ;;  %v2174_v49 = vpop.xlane.xlu1 %321 }
 0x421   :  { %v1764_v26 = vpop.f32.mrb[5].mxu1 }
 0x43b   :  { %v435_v30 = vpop.xlane.xlu0 %434 }
 0x43c   :  { %v437_v31 = vadd.f32 %v435_v30, %v2164_v27 }
 0x43e   :  { %v439_v33 = vmul.f32 0.5, %v437_v31 }
 0x440   :  { %v460_v35 = vsub.f32 %v2073_v36, %v439_v33 }
 0x442   :  { %v462_v37 = vsub.f32 %v460_v35, %v2090_v58 }
 0x443   :  { %v386_v41 = vpop.permute.xlu0 %385 }
 0x444   :  { %v465_v38 = vmul.f32 1.442695, %v462_v37 }
 0x446   :  { %1906 = vpow2.f32 %v465_v38 }
 0x450   :  { %v1907_v39 = vpop.eup %1906 }
 0x451   :  { %v468_v40 = vadd.f32 1e-06, %v1907_v39 }
 0x453   :  { %v470_v42 = vmul.f32 0.25, %v468_v40 }
 0x455   :  { %v2169_v43 = vmul.f32 %v470_v42, %v386_v41 }
 0x457   :  { %1272 = vrot.lane.b32.xlu1 %v2169_v43, %s1946_s10  ;;  %v1256_v17 = vsel %vm442_vm2, %v2169_v43, 0.0 }
 0x458   :  { %v1257_v19 = vrot.slane %v1256_v17, 4 }
 0x45a   :  { %v1258_v31 = vadd.f32 %v1257_v19, %v1256_v17 }
 0x45c   :  { %v1259_v37 = vrot.slane %v1258_v31, 2 }
 0x45e   :  { %v1260_v39 = vadd.f32 %v1259_v37, %v1258_v31 }
 0x460   :  { %v1261_v42 = vrot.slane %v1260_v39, 1 }
 0x470   :  { %v342_v48 = vpop.xlane.xlu0 %341 }
 0x471   :  { %v344_v51 = vadd.f32 %v342_v48, %v2174_v49 }
 0x473   :  { %v346_v56 = vmul.f32 0.5, %v344_v51 }
 0x474   :  { %v1895_v52 = vpop.permute.xlu0 %1894 }
 0x475   :  { %v1897_v53 = vunpack.i.h.bf16 %v1895_v52  ;;  %v1896_v54 = vunpack.i.l.bf16 %v1895_v52  ;;  %v366_v59 = vsub.f32 %v2073_v36, %v346_v56  ;;  %v446_v36 = vsel %vm442_vm2, %v2069_v32, -inf }
 0x477   :  { %v1860_v57 = vpack.c.bf16 %v1897_v53, %v1896_v54  ;;  %v369_v34 = vsub.f32 %v366_v59, %v2090_v58 }
 0x479   :  { %1862 = vmatpush3.bf16.xpose.msk.msra.mxu0 %vm2183_vm5, %v1860_v57  ;;  %v372_v60 = vmul.f32 1.442695, %v369_v34 }
 0x47a   :  { %1791 = vmatprep.subr.mxu0 %v42_v50 }
 0x47b   :  { %687 = vadd.xlane.f32.xlu1 %v686_v45  ;;  %1908 = vpow2.f32 %v372_v60 }
 0x47c   :  { %v881_v46 = vpop.f32.mrb[6].mxu1 }
 0x47d   :  { %v1776_v47 = vpop.f32.mrb[7].mxu1 }
 0x47e   :  { %v1262_v47 = vadd.f32 %v1261_v42, %v1260_v39 }
 0x485   :  { %v1909_v62 = vpop.eup %1908 }
 0x486   :  { %v375_v63 = vadd.f32 1e-06, %v1909_v62 }
 0x488   :  { %v377_v0 = vmul.f32 0.25, %v375_v63 }
 0x48a   :  { %v2195_v23 = vmul.f32 %v386_v41, %v377_v0 }
 0x48c   :  { %1308 = vrot.lane.b32.xlu1 %v42_v50, %s1946_s10  ;;  %v1056_v54 = vsel %vm316_vm1, %v2195_v23, 0.0 }
 0x48d   :  { %v1057_v56 = vrot.slane %v1056_v54, 4 }
 0x4b5   :  { %1067 = vxpose.xlu1.b32.start.end [1/1] (short) (narrow) %v2195_v23, 16 }
 0x4c9   :  { %v1273_v1 = vpop.permute.xlu1 %1272 }
 0x4ca   :  { %1275 = vxpose.xlu0.b32.start.end [1/1] (short) (narrow) %v1273_v1, 16 }
 0x4d7   :  { %408 = vrot.lane.b32.xlu1 %v324_v2, %s1946_s10 }
 0x4fb   :  { %447 = vmax.xlane.f32.xlu1 %v446_v36 }
 0x508   :  { %v688_v58 = vpop.xlane.xlu1 %687 }
 0x509   :  { %v885_v3 = vadd.f32 1e-06, %v688_v58 }
 0x50b   :  { %1910 = vrcp.f32 %v885_v3 }
 0x50c   :  { %v1309_v7 = vpop.permute.xlu1 %1308 }
 0x515   :  { %v1911_v4 = vpop.eup %1910 }
 0x516   :  { %v887_v5 = vmul.f32 %v1911_v4, %v881_v46 }
 0x518   :  { %1782 = vmatmul.mubr.msk.f32.vlgmr.msra.gmra.mrb[6].mxu0 %vm316_vm1, %v887_v5 }
 0x519   :  { %1792 = vmatpush3.msra.mxu0 %v42_v50 }
 0x51a   :  { %1803 = vmatprep.subr.mxu0 %v1309_v7 }
 0x535   :  { %v1083_v8 = vpop.trf.xlu1 }
 0x536   :  { %1793 = vmatprep.mubr.msk.f32.mxu0 %vm516_vm3, %v1083_v8 }
 0x539   :  { %v1084_v21 = vpop.trf.xlu1 }
 0x53a   :  { %1794 = vmatmul.mubr.msk.f32.vlgmr.msra.gmra.mrb[8].mxu0 %vm516_vm3, %v1084_v21  ;;  %v1653_v21 = vld [vmem:[%s2273_s8] ss:$0 sm:$0xff]  ;;  %s1951_s8 = smov [#allocation2]  }
 0x53b   :  { %1804 = vmatpush3.msra.mxu0 %v1309_v7  ;;  %s1624_s24 = sshll.u32 %s1951_s8, 4  ;;  %s1625_s24 = int_to_ptr.vmem [resolvable:$true] %s1624_s24 }
 0x53c   :  { %1873 = vmatprep.subr.bf16.mxu0 %v1948_v28  ;;  %s1922_s25 = scalar_lea.vmem %s1625_s24, 256  ;;  %p1927_p1 = scmp.lt.s32.totalorder %s1625_s24, %s1625_s24 }
 0x53d   :  { %p1923_p0 = scmp.ne.s32.totalorder %s1625_s24, %s1922_s25  ;;  %p1928_p2 = scmp.lt.s32.totalorder %s1922_s25, %s1922_s25 }
 0x53f   :  { %p1929_p3 = por %p1928_p2, %p1927_p1 }
 0x541   :  { %p1930_p4 = pnand %p1929_p3, %p1923_p0 }
 0x549   :  { %v409_v9 = vpop.permute.xlu1 %408 }
 0x54a   :  { %v415_v10 = vsel %vm316_vm1, %v409_v9, 0.0  ;;  %v1291_v11 = vpop.trf.xlu0 }
 0x54b   :  { %416 = vadd.xlane.f32.xlu0 %v415_v10  ;;  %1805 = vmatprep.mubr.msk.f32.mxu0 %vm516_vm3, %v1291_v11 }
 0x54e   :  { %v1292_v13 = vpop.trf.xlu0 }
 0x54f   :  { %329 = vadd.xlane.f32.xlu0 %v328_v12  ;;  %1806 = vmatmul.mubr.msk.f32.vlgmr.msra.gmra.mrb[10].mxu0 %vm516_vm3, %v1292_v13 }
 0x550   :  { %1876 = vmatpush3.bf16.xpose.msk.msra.mxu0 %vm2183_vm5, %v1860_v57  ;;  %1819 = vmatprep.mubr.msk.f32.mxu0 %vm1949_vm4, %v1950_v29 }
 0x553   :  { %353 = vmax.xlane.f32.xlu0 %v352_v6 }
 0x557   :  { %482 = vadd.xlane.f32.xlu0 %v481_v14 }
 0x588   :  { %v448_v26 = vpop.xlane.xlu1 %447 }
 0x5d8   :  { %v417_v16 = vpop.xlane.xlu0 %416 }
 0x5d9   :  { %v419_v18 = vadd.f32 %v417_v16, %v2164_v27 }
 0x5db   :  { %v421_v15 = vmul.f32 0.5, %v419_v18 }
 0x5dc   :  { %v330_v22 = vpop.xlane.xlu0 %329 }
 0x5dd   :  { %v441_v24 = vsub.f32 %v2069_v32, %v421_v15  ;;  %v332_v40 = vadd.f32 %v330_v22, %v2174_v49 }
 0x5df   :  { %v450_v30 = vsub.f32 %v441_v24, %v448_v26  ;;  %v334_v44 = vmul.f32 0.5, %v332_v40 }
 0x5e0   :  { %v354_v33 = vpop.xlane.xlu0 %353 }
 0x5e1   :  { %v453_v35 = vmul.f32 1.442695, %v450_v30  ;;  %v348_v50 = vsub.f32 %v2069_v32, %v334_v44  ;;  %v1058_v32 = vadd.f32 %v1057_v56, %v1056_v54 }
 0x5e3   :  { %1912 = vpow2.f32 %v453_v35  ;;  %v356_v49 = vsub.f32 %v348_v50, %v354_v33  ;;  %v1059_v57 = vrot.slane %v1058_v32, 2 }
 0x5e4   :  { %v483_v61 = vpop.xlane.xlu0 %482 }
 0x5e5   :  { %v671_v38 = vadd.f32 1e-06, %v483_v61  ;;  %v359_v53 = vmul.f32 1.442695, %v356_v49  ;;  %v1060_v34 = vadd.f32 %v1059_v57, %v1058_v32 }
 0x5e7   :  { %1914 = vrcp.f32 %v671_v38  ;;  %v1061_v62 = vrot.slane %v1060_v34, 1 }
 0x5e8   :  { %1916 = vpow2.f32 %v359_v53 }
 0x5e9   :  { %v1062_v2 = vadd.f32 %v1061_v62, %v1060_v34 }
 0x5eb   :  { %v967_v41 = vpop.f32.mrb[6].mxu0 }
 0x5ec   :  { %v1783_v27 = vpop.f32.mrb[7].mxu0 }
 0x5ed   :  { %v1913_v43 = vpop.eup %1912 }
 0x5ee   :  { %v456_v45 = vadd.f32 1e-06, %v1913_v43 }
 0x5f0   :  { %v458_v46 = vmul.f32 0.25, %v456_v45 }
 0x5f1   :  { %v1915_v48 = vpop.eup %1914 }
 0x5f2   :  { %1393 = vrot.lane.b32.xlu0 %v458_v46, %s1946_s10  ;;  %v1263_v51 = vmul.f32 %v1262_v47, %v458_v46  ;;  %v673_v52 = vmul.f32 %v1915_v48, %v2162_v20  ;;  %v1917_v59 = vpop.eup %1916 }
 0x5f3   :  { %v362_v60 = vadd.f32 1e-06, %v1917_v59 }
 0x5f4   :  { %1265 = vrot.lane.b32.xlu1 %v1263_v51, %s1946_s10  ;;  %1789 = vmatmul.mubr.msk.f32.vlgmr.msra.gmra.mrb[8].mxu1 %vm316_vm1, %v673_v52 }
 0x5f5   :  { %1800 = vmatprep.mubr.msk.f32.mxu1 %vm1949_vm4, %v1950_v29  ;;  %v364_v0 = vmul.f32 0.25, %v362_v60 }
 0x5f7   :  { %v1063_v36 = vmul.f32 %v1062_v2, %v364_v0 }
 0x5f9   :  { %v1064_v23 = vsel %vm316_vm1, %v1063_v36, 0.0 }
 0x60d   :  { %v1795_v20 = vpop.f32.mrb[8].mxu0 }
 0x60e   :  { %v1171_v63 = vpop.f32.mrb[9].mxu0 }
 0x60f   :  { %v1868_v1 = vpack.c.bf16 %v1795_v20, %v1171_v63 }
 0x611   :  { %1869 = vmatpush3.bf16.msra.mxu1 %v1868_v1 }
 0x612   :  { %1870 = vmatprep.subr.bf16.mxu1 %v1948_v28 }
 0x614   :  { %1801 = vmatmul.mubr.msk.f32.vlgmr.msra.gmra.mrb[10].mxu1 %vm316_vm1, %v364_v0 }
 0x615   :  { %1812 = vmatprep.mubr.msk.f32.mxu1 %vm1949_vm4, %v1950_v29 }
 0x618   :  { %1065 = vadd.xlane.f32.xlu1 %v1064_v23 }
 0x622   :  { %v1807_v58 = vpop.f32.mrb[10].mxu0 }
 0x623   :  { %v1383_v3 = vpop.f32.mrb[11].mxu0 }
 0x624   :  { %v1871_v4 = vpack.c.bf16 %v1807_v58, %v1383_v3 }
 0x626   :  { %1872 = vmatpush3.bf16.msra.mxu1 %v1871_v4 }
 0x627   :  { %1877 = vmatprep.subr.bf16.mxu1 %v1948_v28 }
 0x664   :  { %v1394_v5 = vpop.permute.xlu0 %1393 }
 0x665   :  { %1813 = vmatmul.mubr.msk.f32.vlgmr.msra.gmra.mrb[12].mxu1 %vm316_vm1, %v1394_v5 }
 0x666   :  { %v1266_v7 = vpop.permute.xlu1 %1265  ;;  %1880 = vmatpush3.bf16.xpose.msk.msra.mxu1 %vm2183_vm5, %v2159_v25  ;;  %1826 = vmatprep.mubr.msk.f32.mxu1 %vm1949_vm4, %v1950_v29 }
 0x667   :  { %v1268_v8 = vsel %vm316_vm1, %v1266_v7, 0.0 }
 0x668   :  { %1269 = vadd.xlane.f32.xlu0 %v1268_v8 }
 0x6a5   :  { %v1066_v12 = vpop.xlane.xlu1 %1065 }
 0x6a6   :  { %v1253_v13 = vadd.f32 1e-06, %v1066_v12 }
 0x6a8   :  { %1918 = vrcp.f32 %v1253_v13 }
 0x6b2   :  { %v1919_v25 = vpop.eup %1918 }
 0x6c7   :  { %v1044_v9 = vpop.f32.mrb[8].mxu1 }
 0x6c8   :  { %v1045_v28 = vadd.f32 %v1044_v9, %v967_v41  ;;  %v1790_v10 = vpop.f32.mrb[9].mxu1 }
 0x6ca   :  { %v1054_v11 = vadd.f32 %v1653_v21, %v1045_v28 }
 0x6cc   :  { %1055 = vst.msk [vmem:[#allocation2] sm:$0xff] %vm316_vm1, %v1054_v11 }
 0x6e7   :  { %v1249_v55 = vpop.f32.mrb[10].mxu1 }
 0x6e8   :  { %v1255_v6 = vmul.f32 %v1919_v25, %v1249_v55  ;;  %v1802_v29 = vpop.f32.mrb[11].mxu1 }
 0x6ea   :  { %1827 = vmatmul.mubr.msk.f32.vlgmr.msra.gmra.mrb[14].mxu1 %vm316_vm1, %v1255_v6 }
 0x6f5   :  { %v1270_v14 = vpop.xlane.xlu0 %1269 }
 0x6f6   :  { %v1467_v16 = vadd.f32 1e-06, %v1270_v14 }
 0x6f8   :  { %1920 = vrcp.f32 %v1467_v16 }
 0x702   :  { %v1921_v17 = vpop.eup %1920 }
 0x738   :  { %v1463_v18 = vpop.f32.mrb[12].mxu1 }
 0x739   :  { %v1469_v15 = vmul.f32 %v1921_v17, %v1463_v18  ;;  %v1814_v19 = vpop.f32.mrb[13].mxu1 }
 0x73b   :  { %1820 = vmatmul.mubr.msk.f32.vlgmr.msra.gmra.mrb[12].mxu0 %vm316_vm1, %v1469_v15 }
 0x7bd   :  { %v1612_v22 = vpop.f32.mrb[14].mxu1 }
 0x7be   :  { %v1828_v24 = vpop.f32.mrb[15].mxu1 }
 0x80e   :  { %v1539_v26 = vpop.f32.mrb[12].mxu0 }
 0x80f   :  { %v1613_v30 = vadd.f32 %v1612_v22, %v1539_v26  ;;  %v1821_v31 = vpop.f32.mrb[13].mxu0 }
 0x811   :  { %v1616_v33 = vadd.f32 %v1653_v21, %v1613_v30 }
 0x813   :  { %1618 = vst.msk [vmem:[#allocation2 + $0x8] sm:$0xff] %vm316_vm1, %v1616_v33 }
 0x814   :  { %1933 = shalt.err (!%p1930_p4)
}
 0x815   :  { %s1934_s6 = scalar_lea.hbm %s2274_s9, 256 }
 0x816   :  { %p1935_p5 = scmp.ne.s32.totalorder %s2274_s9, %s1934_s6  ;;  %p1938_p6 = scmp.lt.u32.totalorder %s1934_s6, %s2274_s9 }
 0x818   :  { %p1940_p7 = pnand %p1938_p6, %p1935_p5 }
 0x81a   :  { %1943 = shalt.err (!%p1940_p7)
}
 0x81b   :  { %s1952_s10 = smov 128   ;;  %s1953_s11 = smov 8  }
 0x81c   :  { %1630 = dma.vmem_to_hbm [thread:$0]  %s1625_s24, 256, %s2274_s9, [#allocation3], %s1952_s10, %s1952_s10, %s1953_s11  }
 0x81d   :  { %1944 = dma.done.wait [#allocation3], 256  }
 0x81e   :  { %1945 = vsyncadd [#allocation3], 4294967040 }
 0x81f   :  { %1634 = vsyncpa [#allocation3], 1 }

</bundles_post_ra>
